<compile_context>
chip_gen: v6e
topology: v6e:2x2x1
jax: 0.10.0
libtpu: 0.0.40
codegen_flags: <defaults>
</compile_context>

<pallas_src>
import functools

import jax
import jax.numpy as jnp
from jax.experimental import pallas as pl
from jax.experimental.pallas import tpu as pltpu

ALPHA = 0.09
GAMMA = 2.0

_LANES = 128
_SUBLANES = 8
_GROUP_ELEMS = _SUBLANES * _LANES      # 1024 elements per (8, 128) group
_CHUNK_GROUPS = 8                      # (8, 8, 128) sub-slab per inner-loop step
_MAX_GROUPS_PER_BLOCK = 512            # 4096 rows -> 2 MiB f32 per input tile
_SENTINEL = -1e4                       # pad logit: contributes exactly 0


def _round_up(x, m):
    return ((x + m - 1) // m) * m


def _focal_loss_kernel(x_ref, t_ref, out_ref, *, alpha, gamma,
                       chunk_groups, num_chunks):
    i = pl.program_id(1)   # reduction step within this split ("arbitrary")

    @pl.when(i == 0)
    def _():
        out_ref[...] = jnp.zeros_like(out_ref)

    c_a0 = jnp.float32(1.0 - alpha)
    c_a1 = jnp.float32(2.0 * alpha - 1.0)

    def chunk_sum(xs, ts):
        # All math in f32 on a small sub-slab so intermediates stay in vregs.
        x = xs.astype(jnp.float32)
        t = ts.astype(jnp.float32)
        e = jnp.exp(-jnp.abs(x))                        # EUP; shared below
        d = 1.0 + e
        ce = jnp.maximum(x, 0.0) - x * t + jnp.log(d)   # stable BCE-with-logits
        r = pl.reciprocal(d, approx=True)               # EUP vrcp
        r = r * (2.0 - d * r)                           # one Newton step (~1e-7 rel)
        p = jnp.where(x >= 0.0, r, 1.0 - r)             # sigmoid(x)
        q = p + t - 2.0 * (p * t)                       # == 1 - p_t
        if gamma == 2.0:
            mod = q * q                                 # no pow -> exp/log
        else:
            mod = q ** gamma                            # fallback for other gamma
        val = ce * mod * (c_a0 + c_a1 * t)              # * alpha_t
        return jnp.sum(val, axis=0)                     # -> (8, 128)

    if num_chunks == 1:
        acc = chunk_sum(x_ref[...], t_ref[...])
    else:
        def body(c, acc):
            g0 = pl.multiple_of(c * chunk_groups, chunk_groups)
            return acc + chunk_sum(x_ref[pl.ds(g0, chunk_groups)],
                                   t_ref[pl.ds(g0, chunk_groups)])
        # Real loop (not unrolled) so live ranges stay bounded -> no vreg spill.
        acc = jax.lax.fori_loop(0, num_chunks, body,
                                jnp.zeros((_SUBLANES, _LANES), jnp.float32))

    out_ref[...] += acc


def focal_loss(inputs, targets, alpha=ALPHA, gamma=GAMMA):
    """Pallas TPU implementation of FocalLoss.forward (returns scalar mean)."""
    assert inputs.shape == targets.shape
    total = inputs.size

    x = inputs.reshape(-1)
    t = targets.reshape(-1)

    groups_needed = pl.cdiv(total, _GROUP_ELEMS)

    if groups_needed >= _CHUNK_GROUPS:
        # 2-way split whenever both streams have work (both TCs busy on v7x).
        num_splits = 2 if groups_needed >= 2 * _CHUNK_GROUPS else 1
        per_split = pl.cdiv(groups_needed, num_splits)
        blocks_per_split = pl.cdiv(per_split, _MAX_GROUPS_PER_BLOCK)
        groups_per_block = _round_up(pl.cdiv(per_split, blocks_per_split),
                                     _CHUNK_GROUPS)
        chunk_groups = _CHUNK_GROUPS
    else:
        num_splits = 1
        blocks_per_split = 1
        groups_per_block = groups_needed
        chunk_groups = groups_needed
    num_chunks = groups_per_block // chunk_groups

    padded_groups = num_splits * blocks_per_split * groups_per_block
    padded_total = padded_groups * _GROUP_ELEMS

    if padded_total != total:
        # Sentinel pad: logit -1e4 / target 0 contributes exactly 0, so the
        # kernel needs no per-element mask.  Aligned inputs take this branch
        # never; ragged pads are bounded by ~one chunk per block.
        pad = padded_total - total
        x = jnp.pad(x, (0, pad), constant_values=_SENTINEL)
        t = jnp.pad(t, (0, pad), constant_values=0)

    x3 = x.reshape(padded_groups, _SUBLANES, _LANES)
    t3 = t.reshape(padded_groups, _SUBLANES, _LANES)

    kernel = functools.partial(
        _focal_loss_kernel, alpha=alpha, gamma=gamma,
        chunk_groups=chunk_groups, num_chunks=num_chunks)

    in_spec = pl.BlockSpec(
        (groups_per_block, _SUBLANES, _LANES),
        lambda s, i: (s * blocks_per_split + i, 0, 0))

    partial_sums = pl.pallas_call(
        kernel,
        out_shape=jax.ShapeDtypeStruct((num_splits, _SUBLANES, _LANES),
                                       jnp.float32),
        grid_spec=pltpu.PrefetchScalarGridSpec(
            num_scalar_prefetch=0,
            grid=(num_splits, blocks_per_split),
            in_specs=[in_spec, in_spec],
            out_specs=pl.BlockSpec((None, _SUBLANES, _LANES),
                                   lambda s, i: (s, 0, 0)),
        ),
        compiler_params=pltpu.CompilerParams(
            dimension_semantics=("parallel", "arbitrary"),
            vmem_limit_bytes=32 * 1024 * 1024),
    )(x3, t3)

    # Tiny epilogue: reduce the (num_splits, 8, 128) partials and take the mean.
    return jnp.sum(partial_sums) / jnp.float32(total)


def _focal_loss_ref(inputs, targets, alpha=ALPHA, gamma=GAMMA):
    """Pure-JAX reference matching the PyTorch module."""
    x = inputs.astype(jnp.float32)
    t = targets.astype(jnp.float32)
    p = jax.nn.sigmoid(x)
    ce = jnp.maximum(x, 0.0) - x * t + jnp.log1p(jnp.exp(-jnp.abs(x)))
    p_t = p * t + (1.0 - p) * (1.0 - t)
    loss = ce * (1.0 - p_t) ** gamma
    alpha_t = alpha * t + (1.0 - alpha) * (1.0 - t)
    return jnp.mean(loss * alpha_t)


def _make_inputs(key, shape, dtype):
    k1, k2 = jax.random.split(key)
    logits = jax.random.normal(k1, shape, dtype=jnp.float32).astype(dtype)
    targets = (jax.random.uniform(k2, shape) > 0.5).astype(dtype)
    return logits, targets


if __name__ == "__main__":
    key = jax.random.PRNGKey(0)
    k1, k2, k3 = jax.random.split(key, 3)

    # Primary case: small NCHW logits + binary targets (2048 elems, one block).
    x, t = _make_inputs(k1, (2, 4, 16, 16), jnp.float32)
    out = jax.block_until_ready(focal_loss(x, t))
    ref = _focal_loss_ref(x, t)
    assert jnp.allclose(out, ref, rtol=1e-4, atol=1e-7), (out, ref)

    # Ragged case exercising the sentinel padding (210 elems, not a multiple).
    x, t = _make_inputs(k2, (2, 3, 7, 5), jnp.float32)
    out = jax.block_until_ready(focal_loss(x, t))
    ref = _focal_loss_ref(x, t)
    assert jnp.allclose(out, ref, rtol=1e-4, atol=1e-7), (out, ref)

    # Multi-chunk case exercising the fori_loop accumulator + 2-way split, bf16.
    x, t = _make_inputs(k3, (2, 8, 128, 128), jnp.bfloat16)
    out = jax.block_until_ready(focal_loss(x, t))
    ref = _focal_loss_ref(x, t)
    assert jnp.allclose(out, ref, rtol=1e-4, atol=1e-7), (out, ref)

    print("KERNEL_OK")
</pallas_src>

<mosaic_0001>
module attributes {stable_mosaic.version = 11 : i64} {
  func.func @_focal_loss_kernel(%arg0: i32, %arg1: i32, %arg2: memref<2x8x128xf32, #tpu.memory_space<vmem>>, %arg3: memref<2x8x128xf32, #tpu.memory_space<vmem>>, %arg4: memref<1x8x128xf32, #tpu.memory_space<vmem>>) attributes {dimension_semantics = [#tpu.dimension_semantics<parallel>, #tpu.dimension_semantics<arbitrary>], iteration_bounds = array<i64: 1, 1>, scalar_prefetch = 0 : i64, scratch_operands = 0 : i64, tpu.core_type = #tpu.core_type<tc>, window_params = [{transform_indices = @transform_0, window_bounds = array<i64: 2, 8, 128>}, {transform_indices = @transform_1, window_bounds = array<i64: 2, 8, 128>}, {transform_indices = @transform_2, window_bounds = array<i64: 1, 8, 128>}]} {
    %c0_i32 = arith.constant 0 : i32
    %0 = arith.cmpi eq, %arg1, %c0_i32 : i32
    %1 = arith.extui %0 : i1 to i32
    %c0_i32_0 = arith.constant 0 : i32
    %2 = arith.cmpi ne, %1, %c0_i32_0 : i32
    scf.if %2 {
      %cst_21 = arith.constant 0.000000e+00 : f32
      %46 = vector.broadcast %cst_21 : f32 to vector<8x128xf32>
      %c0_22 = arith.constant 0 : index
      %c0_23 = arith.constant 0 : index
      %c0_24 = arith.constant 0 : index
      %47 = vector.load %arg4[%c0_22, %c0_23, %c0_24] : memref<1x8x128xf32, #tpu.memory_space<vmem>>, vector<1x8x128xf32>
      %48 = vector.shape_cast %47 : vector<1x8x128xf32> to vector<8x128xf32>
      %49 = vector.shape_cast %46 : vector<8x128xf32> to vector<1x8x128xf32>
      tpu.vector_store %arg4[%c0_22, %c0_23, %c0_24], %49 {strides = array<i32>} : memref<1x8x128xf32, #tpu.memory_space<vmem>>, vector<1x8x128xf32>,
    } else {
    }
    %c0 = arith.constant 0 : index
    %c0_1 = arith.constant 0 : index
    %c0_2 = arith.constant 0 : index
    %3 = vector.load %arg2[%c0, %c0_1, %c0_2] : memref<2x8x128xf32, #tpu.memory_space<vmem>>, vector<2x8x128xf32>
    %c0_3 = arith.constant 0 : index
    %c0_4 = arith.constant 0 : index
    %c0_5 = arith.constant 0 : index
    %4 = vector.load %arg3[%c0_3, %c0_4, %c0_5] : memref<2x8x128xf32, #tpu.memory_space<vmem>>, vector<2x8x128xf32>
    %5 = math.absf %3 : vector<2x8x128xf32>
    %cst = arith.constant 0.000000e+00 : f32
    %6 = vector.broadcast %cst : f32 to vector<2x8x128xf32>
    %7 = arith.subf %6, %5 : vector<2x8x128xf32>
    %8 = math.exp %7 : vector<2x8x128xf32>
    %cst_6 = arith.constant 1.000000e+00 : f32
    %9 = vector.broadcast %cst_6 : f32 to vector<2x8x128xf32>
    %10 = arith.addf %9, %8 : vector<2x8x128xf32>
    %cst_7 = arith.constant 0.000000e+00 : f32
    %11 = vector.broadcast %cst_7 : f32 to vector<2x8x128xf32>
    %12 = arith.maximumf %3, %11 : vector<2x8x128xf32>
    %13 = arith.mulf %3, %4 : vector<2x8x128xf32>
    %14 = arith.subf %12, %13 : vector<2x8x128xf32>
    %15 = math.log %10 : vector<2x8x128xf32>
    %16 = arith.addf %14, %15 : vector<2x8x128xf32>
    %17 = tpu.reciprocal %10 {approx = true} : vector<2x8x128xf32> -> vector<2x8x128xf32>
    %18 = arith.mulf %10, %17 : vector<2x8x128xf32>
    %cst_8 = arith.constant 2.000000e+00 : f32
    %19 = vector.broadcast %cst_8 : f32 to vector<2x8x128xf32>
    %20 = arith.subf %19, %18 : vector<2x8x128xf32>
    %21 = arith.mulf %17, %20 : vector<2x8x128xf32>
    %cst_9 = arith.constant 0.000000e+00 : f32
    %22 = vector.broadcast %cst_9 : f32 to vector<2x8x128xf32>
    %23 = arith.cmpf oge, %3, %22 : vector<2x8x128xf32>
    %cst_10 = arith.constant 1.000000e+00 : f32
    %24 = vector.broadcast %cst_10 : f32 to vector<2x8x128xf32>
    %25 = arith.subf %24, %21 : vector<2x8x128xf32>
    %26 = arith.select %23, %21, %25 : vector<2x8x128xi1>, vector<2x8x128xf32>
    %27 = arith.addf %26, %4 : vector<2x8x128xf32>
    %28 = arith.mulf %26, %4 : vector<2x8x128xf32>
    %cst_11 = arith.constant 2.000000e+00 : f32
    %29 = vector.broadcast %cst_11 : f32 to vector<2x8x128xf32>
    %30 = arith.mulf %29, %28 : vector<2x8x128xf32>
    %31 = arith.subf %27, %30 : vector<2x8x128xf32>
    %32 = arith.mulf %31, %31 : vector<2x8x128xf32>
    %33 = arith.mulf %16, %32 : vector<2x8x128xf32>
    %cst_12 = arith.constant -0.819999992 : f32
    %34 = vector.broadcast %cst_12 : f32 to vector<2x8x128xf32>
    %35 = arith.mulf %34, %4 : vector<2x8x128xf32>
    %cst_13 = arith.constant 9.100000e-01 : f32
    %36 = vector.broadcast %cst_13 : f32 to vector<2x8x128xf32>
    %37 = arith.addf %36, %35 : vector<2x8x128xf32>
    %38 = arith.mulf %33, %37 : vector<2x8x128xf32>
    %cst_14 = arith.constant dense<0.000000e+00> : vector<8x128xf32>
    %39 = vector.multi_reduction <add>, %38, %cst_14 [0] : vector<2x8x128xf32> to vector<8x128xf32>
    %c0_15 = arith.constant 0 : index
    %c0_16 = arith.constant 0 : index
    %c0_17 = arith.constant 0 : index
    %40 = vector.load %arg4[%c0_15, %c0_16, %c0_17] : memref<1x8x128xf32, #tpu.memory_space<vmem>>, vector<1x8x128xf32>
    %41 = vector.shape_cast %40 : vector<1x8x128xf32> to vector<8x128xf32>
    %42 = arith.addf %41, %39 : vector<8x128xf32>
    %c0_18 = arith.constant 0 : index
    %c0_19 = arith.constant 0 : index
    %c0_20 = arith.constant 0 : index
    %43 = vector.load %arg4[%c0_18, %c0_19, %c0_20] : memref<1x8x128xf32, #tpu.memory_space<vmem>>, vector<1x8x128xf32>
    %44 = vector.shape_cast %43 : vector<1x8x128xf32> to vector<8x128xf32>
    %45 = vector.shape_cast %42 : vector<8x128xf32> to vector<1x8x128xf32>
    tpu.vector_store %arg4[%c0_18, %c0_19, %c0_20], %45 {strides = array<i32>} : memref<1x8x128xf32, #tpu.memory_space<vmem>>, vector<1x8x128xf32>,
    return
  }
  func.func @transform_0(%arg0: i32, %arg1: i32) -> (i32, i32, i32) {
    %c1_i32 = arith.constant 1 : i32
    %0 = arith.muli %arg0, %c1_i32 : i32
    %1 = arith.addi %0, %arg1 : i32
    %c0_i32 = arith.constant 0 : i32
    %c0_i32_0 = arith.constant 0 : i32
    %c0_i32_1 = arith.constant 0 : i32
    return %1, %c0_i32, %c0_i32_0 : i32, i32, i32
  }
  func.func @transform_1(%arg0: i32, %arg1: i32) -> (i32, i32, i32) {
    %c1_i32 = arith.constant 1 : i32
    %0 = arith.muli %arg0, %c1_i32 : i32
    %1 = arith.addi %0, %arg1 : i32
    %c0_i32 = arith.constant 0 : i32
    %c0_i32_0 = arith.constant 0 : i32
    %c0_i32_1 = arith.constant 0 : i32
    return %1, %c0_i32, %c0_i32_0 : i32, i32, i32
  }
  func.func @transform_2(%arg0: i32, %arg1: i32) -> (i32, i32, i32) {
    %c0_i32 = arith.constant 0 : i32
    %c0_i32_0 = arith.constant 0 : i32
    %c0_i32_1 = arith.constant 0 : i32
    return %arg0, %c0_i32, %c0_i32_0 : i32, i32, i32
  }
}

</mosaic_0001>

<bundles_post_ra>
// kernel: tpu_custom_call.1
= control target key start
LH: loop header
LB: loop body
LE: loop exit
PB: predicated region body
PF: predicated region fallthrough
CT: control target
= control target key end

     0   :  { %7 = vsyncpa [#allocation3], 0  ;;  %s248_s0 = inlined_call_operand.hbm [shape: f32[2,8,128], index: 0, kind: input, shape index: {}]   ;;  %s249_s1 = inlined_call_operand.hbm [shape: f32[2,8,128], index: 1, kind: input, shape index: {}]   ;;  %s250_s2 = inlined_call_operand.hbm [shape: f32[1,8,128], index: 2, kind: output, shape index: {}]  }
   0x1   :  { %8 = vsyncpa [#allocation6], 0 }
   0x2   :  { %9 = vsyncpa [#allocation4], 0  ;;  %s219_s9 = smov [#allocation2]  }
   0x3   :  { %s19_s10 = sshll.u32 %s219_s9, 4  ;;  %s20_s10 = int_to_ptr.vmem [resolvable:$true] %s19_s10 }
   0x4   :  { %s161_s11 = scalar_lea.vmem %s20_s10, 256  ;;  %p166_p1 = scmp.lt.s32.totalorder %s20_s10, %s20_s10 }
   0x5   :  { %p162_p0 = scmp.ne.s32.totalorder %s20_s10, %s161_s11  ;;  %p167_p2 = scmp.lt.s32.totalorder %s161_s11, %s161_s11 }
   0x7   :  { %p168_p3 = por %p167_p2, %p166_p1 }
   0x9   :  { %p169_p4 = pnand %p168_p3, %p162_p0 }
   0xb   :  { %172 = shalt.err (!%p169_p4)
}
   0xc   :  { %s220_s12 = smov 128   ;;  %s221_s13 = smov 8  }
   0xd   :  { %25 = dma.hbm_to_vmem [thread:$0]  %s248_s0, 256, %s20_s10, [#allocation3], %s220_s12, %s220_s12, %s221_s13  }
   0xe   :  { %s222_s16 = smov [#allocation5]  }
   0xf   :  { %s35_s17 = sshll.u32 %s222_s16, 4  ;;  %s36_s17 = int_to_ptr.vmem [resolvable:$true] %s35_s17 }
  0x10   :  { %s181_s18 = scalar_lea.vmem %s36_s17, 256  ;;  %p186_p6 = scmp.lt.s32.totalorder %s36_s17, %s36_s17 }
  0x11   :  { %p182_p5 = scmp.ne.s32.totalorder %s36_s17, %s181_s18  ;;  %p187_p7 = scmp.lt.s32.totalorder %s181_s18, %s181_s18 }
  0x13   :  { %p188_p8 = por %p187_p7, %p186_p6 }
  0x15   :  { %p189_p9 = pnand %p188_p8, %p182_p5 }
  0x17   :  { %192 = shalt.err (!%p189_p9)
}
  0x18   :  { %41 = dma.hbm_to_vmem [thread:$0]  %s249_s1, 256, %s36_s17, [#allocation6], %s220_s12, %s220_s12, %s221_s13  }
  0x19   :  { %213 = dma.done.wait [#allocation3], 256  }
  0x1a   :  { %214 = vsyncadd [#allocation3], 4294967040 }
  0x1b   :  { %215 = dma.done.wait [#allocation6], 256  }
  0x1c   :  { %216 = vsyncadd [#allocation6], 4294967040  ;;  %v57_v0 = vld [vmem:[#allocation2] sm:$0xff]  ;;  %v58_v1 = vld [vmem:[#allocation2 + $0x8] sm:$0xff]  ;;  %s223_s0 = smov [#allocation7]  }
  0x1d   :  { %v61_v2 = vand.u32 2147483647, %v57_v0  ;;  %v62_v3 = vand.u32 2147483647, %v58_v1  ;;  %v59_v17 = vld [vmem:[#allocation5] sm:$0xff]  ;;  %v71_v19 = vmax.f32 %v57_v0, 0.0 }
  0x1e   :  { %v73_v20 = vmul.f32 %v59_v17, %v57_v0  ;;  %v60_v22 = vld [vmem:[#allocation5 + $0x8] sm:$0xff]  ;;  %vm91_vm0 = vcmp.ge.f32.partialorder %v57_v0, 0.0  ;;  %v72_v25 = vmax.f32 %v58_v1, 0.0  ;;  %vm92_vm1 = vcmp.ge.f32.partialorder %v58_v1, 0.0  ;;  %s125_s1 = sshll.u32 %s223_s0, 4  ;;  %s126_s1 = int_to_ptr.vmem [resolvable:$true] %s125_s1 }
  0x1f   :  { %v63_v4 = vsub.f32 0.0, %v61_v2  ;;  %v64_v5 = vsub.f32 0.0, %v62_v3  ;;  %v74_v26 = vmul.f32 %v60_v22, %v58_v1  ;;  %v109_v41 = vmul.f32 -0.82, %v59_v17  ;;  %s193_s21 = scalar_lea.vmem %s126_s1, 128  ;;  %p198_p11 = scmp.lt.s32.totalorder %s126_s1, %s126_s1 }
  0x20   :  { %v75_v30 = vsub.f32 %v71_v19, %v73_v20  ;;  %v110_v43 = vmul.f32 -0.82, %v60_v22  ;;  %p194_p10 = scmp.ne.s32.totalorder %s126_s1, %s193_s21  ;;  %p199_p12 = scmp.lt.s32.totalorder %s193_s21, %s193_s21 }
  0x21   :  { %v65_v6 = vmul.f32 1.442695, %v63_v4  ;;  %v67_v7 = vmul.f32 1.442695, %v64_v5  ;;  %v76_v36 = vsub.f32 %v72_v25, %v74_v26  ;;  %v111_v49 = vadd.f32 0.91, %v109_v41 }
  0x22   :  { %v112_v51 = vadd.f32 0.91, %v110_v43  ;;  %p200_p13 = por %p199_p12, %p198_p11 }
  0x23   :  { %141 = vpow2.f32 %v65_v6 }
  0x24   :  { %143 = vpow2.f32 %v67_v7  ;;  %p201_p0 = pnand %p200_p13, %p194_p10 }
  0x30   :  { %v142_v8 = vpop.eup %141 }
  0x31   :  { %v144_v9 = vpop.eup %143  ;;  %v69_v10 = vadd.f32 1.0, %v142_v8 }
  0x32   :  { %v70_v11 = vadd.f32 1.0, %v144_v9 }
  0x33   :  { %145 = vrcp.f32 %v69_v10 }
  0x34   :  { %147 = vrcp.f32 %v70_v11 }
  0x35   :  { %149 = vlog2.f32 %v69_v10 }
  0x36   :  { %151 = vlog2.f32 %v70_v11 }
  0x40   :  { %v146_v12 = vpop.eup %145 }
  0x41   :  { %v148_v13 = vpop.eup %147  ;;  %v85_v14 = vmul.f32 %v146_v12, %v69_v10 }
  0x42   :  { %v86_v15 = vmul.f32 %v148_v13, %v70_v11  ;;  %v150_v24 = vpop.eup %149 }
  0x43   :  { %v87_v16 = vsub.f32 2.0, %v85_v14  ;;  %v152_v28 = vpop.eup %151  ;;  %v78_v32 = vmul.f32 0.6931472, %v150_v24 }
  0x44   :  { %v88_v18 = vsub.f32 2.0, %v86_v15  ;;  %v80_v37 = vmul.f32 0.6931472, %v152_v28 }
  0x45   :  { %v89_v21 = vmul.f32 %v146_v12, %v87_v16  ;;  %v81_v44 = vadd.f32 %v78_v32, %v75_v30 }
  0x46   :  { %v90_v23 = vmul.f32 %v148_v13, %v88_v18  ;;  %v82_v46 = vadd.f32 %v80_v37, %v76_v36 }
  0x47   :  { %v93_v27 = vsub.f32 1.0, %v89_v21 }
  0x48   :  { %v94_v29 = vsub.f32 1.0, %v90_v23 }
  0x49   :  { %v95_v31 = vsel %vm91_vm0, %v89_v21, %v93_v27 }
  0x4a   :  { %v96_v33 = vsel %vm92_vm1, %v90_v23, %v94_v29  ;;  %v97_v34 = vadd.f32 %v95_v31, %v59_v17  ;;  %v99_v35 = vmul.f32 %v95_v31, %v59_v17 }
  0x4b   :  { %v98_v38 = vadd.f32 %v96_v33, %v60_v22  ;;  %v100_v39 = vmul.f32 %v96_v33, %v60_v22 }
  0x4c   :  { %v101_v40 = vmul.f32 2.0, %v99_v35 }
  0x4d   :  { %v102_v42 = vmul.f32 2.0, %v100_v39 }
  0x4e   :  { %v103_v45 = vsub.f32 %v97_v34, %v101_v40 }
  0x4f   :  { %v104_v47 = vsub.f32 %v98_v38, %v102_v42 }
  0x50   :  { %v105_v48 = vmul.f32 %v103_v45, %v103_v45 }
  0x51   :  { %v106_v50 = vmul.f32 %v104_v47, %v104_v47 }
  0x52   :  { %v107_v52 = vmul.f32 %v105_v48, %v81_v44 }
  0x53   :  { %v108_v53 = vmul.f32 %v106_v50, %v82_v46 }
  0x54   :  { %v113_v54 = vmul.f32 %v111_v49, %v107_v52 }
  0x55   :  { %v114_v55 = vmul.f32 %v112_v51, %v108_v53 }
  0x57   :  { %v115_v56 = vadd.f32 %v114_v55, %v113_v54 }
  0x59   :  { %118 = vst [vmem:[#allocation7] sm:$0xff] %v115_v56 }
  0x5a   :  { %204 = shalt.err (!%p201_p0)
}
  0x5b   :  { %128 = dma.vmem_to_hbm [thread:$0]  %s126_s1, 128, %s250_s2, [#allocation4]  }
  0x5c   :  { %217 = dma.done.wait [#allocation4], 128  }
  0x5d   :  { %218 = vsyncadd [#allocation4], 4294967168 }
  0x5e   :  { %132 = vsyncpa [#allocation3], 1 }
  0x5f   :  { %133 = vsyncpa [#allocation6], 1 }
  0x60   :  { %134 = vsyncpa [#allocation4], 1 }

</bundles_post_ra>
